<compile_context>
chip_gen: v7x
topology: tpu7x:2x2x1
jax: 0.10.0
libtpu: 0.0.40
codegen_flags: <defaults>
</compile_context>

<pallas_src>
import jax
import jax.numpy as jnp
from jax.experimental import pallas as pl
from jax.experimental.pallas import tpu as pltpu

_LANES = 128


def _round_up(x: int, m: int) -> int:
    return ((x + m - 1) // m) * m


def linear_kernel(params_ref, x_ref, o_ref):
    # params_ref: SMEM (3,) f32          -> [w0, w1, bias]
    # x_ref:      VMEM (2, bt, 128) f32  -> feature-major, sublane/lane-dense
    # o_ref:      VMEM (bt, 128) f32
    w0 = params_ref[0]
    w1 = params_ref[1]
    b = params_ref[2]
    # Pure VPU: 2 vmul + 2 vadd per full (8, 128) vreg, no MXU push/pop.
    o_ref[...] = (w0 * x_ref[0] + w1 * x_ref[1] + b).astype(o_ref.dtype)


def custom_model_forward(x, weight, bias, *, max_block_rows: int = 1024):
    """Forward pass of CustomModel (nn.Linear(2, 1)).

    Args:
      x:      (B, 2)  float32
      weight: (1, 2)  float32   (torch layout: [out_features, in_features])
      bias:   (1,)    float32
      max_block_rows: rows of 128 batch elements per grid step
        (1024 -> ~1 MiB of input per step; kept a multiple of 8).
    Returns:
      (B, 1) float32
    """
    B, in_f = x.shape
    out_f = weight.shape[0]
    assert in_f == 2 and out_f == 1, "CustomModel is nn.Linear(2, 1)"

    # Feature-major + sublane/lane-dense: (B, 2) -> (2, n_rows, 128).
    # Pad only to the 128-lane width (NOT to the tile size).
    b_pad = _round_up(B, _LANES)
    n_rows = b_pad // _LANES
    x_t = x.T  # (2, B)   TODO(synk): accept feature-major input to drop this.
    if b_pad != B:
        x_t = jnp.pad(x_t, ((0, 0), (0, b_pad - B)))
    x3 = x_t.reshape(2, n_rows, _LANES)

    # Block rows: full extent if it fits in one block, else a multiple of 8
    # sublanes; Pallas masks the (possibly partial) edge block.
    if n_rows <= max_block_rows:
        bt = n_rows
    else:
        bt = max((max_block_rows // 8) * 8, 8)
    grid = (pl.cdiv(n_rows, bt),)

    # Pack the 3 parameters into one SMEM scalar array: [w0, w1, b].
    params = jnp.concatenate(
        [weight.reshape(-1), bias.reshape(-1)]
    ).astype(jnp.float32)  # (3,)

    out = pl.pallas_call(
        linear_kernel,
        out_shape=jax.ShapeDtypeStruct((n_rows, _LANES), x.dtype),
        grid=grid,
        in_specs=[
            # Tiny parameter vector lives in SMEM (no padded VMEM tile / DMA).
            pl.BlockSpec(memory_space=pltpu.MemorySpace.SMEM),
            # (2, bt, 128): both feature rows of one batch tile, dense vregs.
            pl.BlockSpec((2, bt, _LANES), lambda i: (0, i, 0)),
        ],
        out_specs=pl.BlockSpec((bt, _LANES), lambda i: (i, 0)),
        compiler_params=pltpu.CompilerParams(
            dimension_semantics=("parallel",),
        ),
    )(params, x3)

    # Restore torch's (B, out_features) layout; the slice is an identity
    # (elided) whenever B is already a multiple of 128.
    return out.reshape(b_pad, 1)[:B]


if __name__ == "__main__":
    key = jax.random.PRNGKey(0)
    kx, kw, kb = jax.random.split(key, 3)

    B, IN, OUT = 8, 2, 1

    # Deterministic synthetic inputs / parameters (shapes of nn.Linear(2, 1)).
    x = jax.random.normal(kx, (B, IN), dtype=jnp.float32)
    weight = jax.random.normal(kw, (OUT, IN), dtype=jnp.float32) * 0.5
    bias = jax.random.normal(kb, (OUT,), dtype=jnp.float32) * 0.1

    out = custom_model_forward(x, weight, bias)
    jax.block_until_ready(out)

    ref = x @ weight.T + bias
    assert out.shape == (B, OUT), out.shape
    assert jnp.allclose(out, ref, atol=1e-5, rtol=1e-5)

    # Extra check: non-128-aligned batch with several grid steps and a masked
    # edge block (small max_block_rows just to exercise the tiling path).
    B2 = 3112  # -> 25 rows of 128 lanes, grid of 4 blocks of 8 rows
    x2 = jax.random.normal(kx, (B2, IN), dtype=jnp.float32)
    out2 = custom_model_forward(x2, weight, bias, max_block_rows=8)
    jax.block_until_ready(out2)
    ref2 = x2 @ weight.T + bias
    assert out2.shape == (B2, OUT), out2.shape
    assert jnp.allclose(out2, ref2, atol=1e-5, rtol=1e-5)

    print("KERNEL_OK")
</pallas_src>

<mosaic_0001>
module attributes {stable_mosaic.version = 11 : i64} {
  func.func @linear_kernel(%arg0: i32, %arg1: memref<3xf32, #tpu.memory_space<smem>>, %arg2: memref<2x1x128xf32, #tpu.memory_space<vmem>>, %arg3: memref<1x128xf32, #tpu.memory_space<vmem>>) attributes {dimension_semantics = [#tpu.dimension_semantics<parallel>], iteration_bounds = array<i64: 1>, scalar_prefetch = 0 : i64, scratch_operands = 0 : i64, tpu.core_type = #tpu.core_type<tc>, window_params = [{transform_indices = @transform_0, window_bounds = array<i64: 3>}, {transform_indices = @transform_1, window_bounds = array<i64: 2, 1, 128>}, {transform_indices = @transform_2, window_bounds = array<i64: 1, 128>}]} {
    %c0 = arith.constant 0 : index
    %0 = memref.load %arg1[%c0] : memref<3xf32, #tpu.memory_space<smem>>
    %c1 = arith.constant 1 : index
    %1 = memref.load %arg1[%c1] : memref<3xf32, #tpu.memory_space<smem>>
    %c2 = arith.constant 2 : index
    %2 = memref.load %arg1[%c2] : memref<3xf32, #tpu.memory_space<smem>>
    %c0_0 = arith.constant 0 : index
    %c0_1 = arith.constant 0 : index
    %c0_2 = arith.constant 0 : index
    %3 = vector.load %arg2[%c0_0, %c0_1, %c0_2] : memref<2x1x128xf32, #tpu.memory_space<vmem>>, vector<1x1x128xf32>
    %4 = vector.shape_cast %3 : vector<1x1x128xf32> to vector<1x128xf32>
    %5 = vector.broadcast %0 : f32 to vector<1x128xf32>
    %6 = arith.mulf %5, %4 : vector<1x128xf32>
    %c1_3 = arith.constant 1 : index
    %c0_4 = arith.constant 0 : index
    %c0_5 = arith.constant 0 : index
    %7 = vector.load %arg2[%c1_3, %c0_4, %c0_5] : memref<2x1x128xf32, #tpu.memory_space<vmem>>, vector<1x1x128xf32>
    %8 = vector.shape_cast %7 : vector<1x1x128xf32> to vector<1x128xf32>
    %9 = vector.broadcast %1 : f32 to vector<1x128xf32>
    %10 = arith.mulf %9, %8 : vector<1x128xf32>
    %11 = arith.addf %6, %10 : vector<1x128xf32>
    %12 = vector.broadcast %2 : f32 to vector<1x128xf32>
    %13 = arith.addf %11, %12 : vector<1x128xf32>
    %c0_6 = arith.constant 0 : index
    %c0_7 = arith.constant 0 : index
    %14 = vector.load %arg3[%c0_6, %c0_7] : memref<1x128xf32, #tpu.memory_space<vmem>>, vector<1x128xf32>
    tpu.vector_store %arg3[%c0_6, %c0_7], %13 {strides = array<i32>} : memref<1x128xf32, #tpu.memory_space<vmem>>, vector<1x128xf32>,
    return
  }
  func.func @transform_0(%arg0: i32) -> i32 {
    %c0_i32 = arith.constant 0 : i32
    %c0_i32_0 = arith.constant 0 : i32
    return %c0_i32 : i32
  }
  func.func @transform_1(%arg0: i32) -> (i32, i32, i32) {
    %c0_i32 = arith.constant 0 : i32
    %c0_i32_0 = arith.constant 0 : i32
    %c0_i32_1 = arith.constant 0 : i32
    return %c0_i32, %arg0, %c0_i32_0 : i32, i32, i32
  }
  func.func @transform_2(%arg0: i32) -> (i32, i32) {
    %c0_i32 = arith.constant 0 : i32
    %c0_i32_0 = arith.constant 0 : i32
    return %arg0, %c0_i32 : i32, i32
  }
}

</mosaic_0001>

<bundles_post_ra>
// kernel: tpu_custom_call.1
= control target key start
LH: loop header
LB: loop body
LE: loop exit
PB: predicated region body
PF: predicated region fallthrough
CT: control target
= control target key end

     0   :  { %7 = vsyncpa [#allocation4], 0  ;;  %s140_s0 = inlined_call_operand.hbm [shape: f32[3], index: 0, kind: input, shape index: {}]   ;;  %s141_s1 = inlined_call_operand.vmem [shape: f32[2,1,128], index: 1, kind: input, shape index: {}]   ;;  %s142_s2 = inlined_call_operand.hbm [shape: f32[1,128], index: 2, kind: output, shape index: {}]  }
   0x1   :  { %8 = vsyncpa [#allocation3], 0  ;;  %s57_s11 = scalar_lea.hbm %s140_s0, 16 }
   0x2   :  { %p58_p0 = scmp.ne.s32.totalorder %s140_s0, %s57_s11  ;;  %p61_p1 = scmp.lt.u32.totalorder %s57_s11, %s140_s0 }
   0x4   :  { %p63_p2 = pnand %p61_p1, %p58_p0 }
   0x6   :  { %66 = shalt.err (!%p63_p2)
}
   0x7   :  { %s93_s16 = smov [#allocation2]  }
   0x8   :  { %16 = dma.hbm_to_smem %s140_s0, 16, %s93_s16, [#allocation4]  }
   0x9   :  { %89 = dma.done.wait [#allocation4], 16  }
   0xa   :  { %90 = vsyncadd [#allocation4], 4294967280 }
   0xb   :  { %22 = sfence }
   0xc   :  { %s23_s19 = sld [smem:[#allocation2]]  ;;  %s52_s20 = sld [smem:[#allocation2 + $0x1]]  ;;  %v26_v0 = vld [vmem:[%s141_s1] sm:$0x1]  ;;  %v54_v1 = vld [vmem:[%s141_s1 + $0x1] sm:$0x1] }
   0xd   :  { %s53_s21 = sld [smem:[#allocation2 + $0x2]]  ;;  %s94_s0 = smov [#allocation5]  }
   0xe   :  { %s43_s26 = sshll.u32 %s94_s0, 4  ;;  %s44_s26 = int_to_ptr.vmem [resolvable:$true] %s43_s26 }
   0xf   :  { %s67_s27 = scalar_lea.vmem %s44_s26, 16  ;;  %s71_s28 = scalar_lea.vmem %s44_s26, 32 }
  0x10   :  { %p68_p3 = scmp.ne.s32.totalorder %s44_s26, %s67_s27  ;;  %p72_p4 = scmp.lt.s32.totalorder %s44_s26, %s44_s26 }
  0x11   :  { %p73_p5 = scmp.lt.s32.totalorder %s71_s28, %s67_s27 }
  0x12   :  { %v27_v2 = vstv %s23_s19  ;;  %v31_v3 = vstv %s52_s20 }
  0x13   :  { %v28_v4 = vmul.f32 %v27_v2, %v26_v0  ;;  %v32_v5 = vmul.f32 %v54_v1, %v31_v3  ;;  %v34_v6 = vstv %s53_s21  ;;  %p74_p6 = por %p73_p5, %p72_p4 }
  0x15   :  { %v33_v7 = vadd.f32 %v32_v5, %v28_v4  ;;  %p75_p7 = pnand %p74_p6, %p68_p3 }
  0x17   :  { %v35_v8 = vadd.f32 %v34_v6, %v33_v7 }
  0x19   :  { %36 = vst [vmem:[#allocation5] sm:$0x1] %v35_v8 }
  0x1a   :  { %78 = shalt.err (!%p75_p7)
}
  0x1b   :  { %s79_s30 = scalar_lea.hbm %s142_s2, 16 }
  0x1c   :  { %p80_p8 = scmp.ne.s32.totalorder %s142_s2, %s79_s30  ;;  %p83_p9 = scmp.lt.u32.totalorder %s79_s30, %s142_s2 }
  0x1e   :  { %p85_p10 = pnand %p83_p9, %p80_p8 }
  0x20   :  { %88 = shalt.err (!%p85_p10)
}
  0x21   :  { %46 = dma.vmem_to_hbm [thread:$0]  %s44_s26, 16, %s142_s2, [#allocation3]  }
  0x22   :  { %91 = dma.done.wait [#allocation3], 16  }
  0x23   :  { %92 = vsyncadd [#allocation3], 4294967280 }
  0x24   :  { %50 = vsyncpa [#allocation3], 1 }
  0x25   :  { %51 = vsyncpa [#allocation4], 1 }

</bundles_post_ra>
